<compile_context>
chip_gen: v7x
topology: tpu7x:2x2x1
jax: 0.10.0
libtpu: 0.0.40
codegen_flags: <defaults>
</compile_context>

<pallas_src>
import functools

import numpy as np
import jax
import jax.numpy as jnp
from jax.experimental import pallas as pl
from jax.experimental.pallas import tpu as pltpu


_LANES = 128   # lane width; all kernel tiles are padded/aligned to this


# ----------------------------- Pallas kernel ------------------------------ #
def _make_kernel(np8):
    """Kernel closure over the static per-instance layout (np8 rows/section)."""
    rows = 8 + 3 * np8          # drug(8) | indi(np8) | adr(np8) | adr_pref(np8)
    n_lin = 8 + 2 * np8         # rows participating in mean(Linear(emb))
    LP = _LANES

    def kernel(counts_ref, emb_ref, bcat_ref, par_ref, out_ref):
        f32 = jnp.float32
        b = pl.program_id(0)
        inv_nt = 1.0 / counts_ref[b, 3].astype(f32)            # nt clamped >= 1

        emb = emb_ref[0]                                        # (rows, 128)

        # One fused, lane-aligned MXU pass:
        #   X = [drug; indi; adr; adr_pref] @ [B1 | B2 | B3 | W_b2^T]
        X = jnp.dot(emb, bcat_ref[...], preferred_element_type=f32)   # (rows, 512)
        t1 = X[0:1, 0:LP]                     # drug @ B1        (1, 128)
        t2 = X[0:1, LP:2 * LP]                # drug @ B2        (1, 128)
        t3 = X[8:8 + np8, 2 * LP:3 * LP]      # indi @ B3        (np8, 128)
        lin = X[0:n_lin, 3 * LP:4 * LP]       # [drug;indi;adr] @ W_b2^T

        indi = emb[8:8 + np8, :]
        adr = emb[8 + np8:8 + 2 * np8, :]
        adr_pref = emb[8 + 2 * np8:8 + 3 * np8, :]   # rank-masked adr prefix sums

        indi_sum = jnp.sum(indi, axis=0, keepdims=True)         # (1, 128)
        adr_sum = jnp.sum(adr, axis=0, keepdims=True)           # (1, 128)

        # sum_j (drug @ B @ x_j^T) == (drug @ B) . sum_j x_j    (padded rows = 0)
        b1_val = jnp.sum(t1 * indi_sum)
        b2_val = jnp.sum(t2 * adr_sum)
        # b3 = sum(triu(indi @ B3 @ adr^T, k=1)) == sum(t3 * (rank_mask @ adr))
        b3_val = jnp.sum(t3 * adr_pref)

        # mean(Linear(emb)) folded into the same MXU pass + one sublane reduce;
        # bias_b2 + b_lin are constant-folded into par row 0.
        B2_mean = jnp.sum(lin, axis=0, keepdims=True) * inv_nt  # (1, 128)

        # B = [b1, b2, b3] placed in lanes 0..2 with one iota + nested selects.
        cid = jax.lax.broadcasted_iota(jnp.int32, (1, LP), 1)
        B_row = jnp.where(cid == 0, b1_val,
                          jnp.where(cid == 1, b2_val,
                                    jnp.where(cid == 2, b3_val, 0.0)))

        par = par_ref[...]                                      # (8, 128)
        bias_comb = par[0:1, :]          # bias_b2 + b_lin at lanes [0, K)
        w_sim_row = par[1:2, :]          # final Linear weight at lanes [0, K)
        bias_sim_row = par[2:3, :]       # final Linear bias at lane 0

        # Lanes >= K are exactly zero in every operand, so full-vreg math is safe.
        x = jnp.tanh(B_row + B2_mean + bias_comb)               # (1, 128)
        sim = jnp.sum(x * w_sim_row + bias_sim_row)             # scalar
        out_ref[...] = jnp.broadcast_to(sim, (1, 1, LP))        # lane-dense store

    return kernel


def _pallas_bilinear_sim(counts, emb, bcat, par, np8):
    """Batched pallas_call: grid over instances, parameters resident in VMEM."""
    B, rows, LP = emb.shape
    kernel = _make_kernel(np8)
    grid_spec = pltpu.PrefetchScalarGridSpec(
        num_scalar_prefetch=1,
        grid=(B,),
        in_specs=[
            pl.BlockSpec((1, rows, LP), lambda i, c: (i, 0, 0)),  # per-instance emb
            pl.BlockSpec(bcat.shape, lambda i, c: (0, 0)),        # resident RHS
            pl.BlockSpec(par.shape, lambda i, c: (0, 0)),         # resident params
        ],
        out_specs=pl.BlockSpec((1, 1, LP), lambda i, c: (i, 0, 0)),
    )
    out = pl.pallas_call(
        kernel,
        out_shape=jax.ShapeDtypeStruct((B, 1, LP), jnp.float32),
        grid_spec=grid_spec,
        compiler_params=pltpu.CompilerParams(
            dimension_semantics=("parallel",)),    # shards batch across TCs (v7x)
    )(counts, emb, bcat, par)
    return out[:, 0, 0:1]                          # (B, 1): lane 0 of each row


# --------------------------- parameter packing ----------------------------- #
def pack_params(params):
    """Fold constants and pack all parameters into two lane-aligned tiles."""
    r3 = params["b1"].shape[0]
    K = params["w_b2"].shape[0]
    assert r3 <= _LANES and K <= _LANES
    LP = _LANES
    f32 = jnp.float32
    # Fused 128-lane-aligned RHS: [ B1 | B2 | B3 | W_b2^T ], each in its own
    # 128-column slab so in-kernel slices of X are free vreg views.
    bcat = jnp.zeros((LP, 4 * LP), f32)
    bcat = bcat.at[0:r3, 0:r3].set(params["b1"].astype(f32))
    bcat = bcat.at[0:r3, LP:LP + r3].set(params["b2"].astype(f32))
    bcat = bcat.at[0:r3, 2 * LP:2 * LP + r3].set(params["b3"].astype(f32))
    bcat = bcat.at[0:r3, 3 * LP:3 * LP + K].set(params["w_b2"].astype(f32).T)
    # Tiny params packed into one (8, 128) vreg tile:
    #   row 0: bias_b2 + b_lin (lanes [0, K))
    #   row 1: w_sim           (lanes [0, K))
    #   row 2: bias_sim        (lane 0)
    par = jnp.zeros((8, LP), f32)
    par = par.at[0, 0:K].set((params["bias_b2"] + params["b_lin"]).astype(f32))
    par = par.at[1, 0:K].set(params["w_sim"][0].astype(f32))
    par = par.at[2, 0].set(params["bias_sim"][0].astype(f32))
    return {"bcat": bcat, "par": par}


# ------------------------------ JAX glue ---------------------------------- #
@functools.partial(jax.jit, static_argnames=("d1", "d2", "d3"))
def get_bilinear_sim(indices, d1_eb, d2_eb, d3_eb, packed, d1, d2, d3):
    """Batched forward.  indices: (B, N, 2) int; returns (B, 1) scores."""
    f32 = jnp.float32
    B, N, _ = indices.shape
    np8 = -(-N // 8) * 8                       # pad each section to 8-row multiple
    r3 = d1_eb.shape[1]
    assert r3 <= _LANES

    def prep_one(idx):
        idx = idx.astype(jnp.int32)
        keep = jnp.sum(idx, axis=1) != 0
        dims, eidx = idx[:, 0], idx[:, 1]
        m1 = keep & (dims == d1)
        m2 = keep & (dims == d2)
        m3 = keep & (dims == d3)
        n1 = jnp.sum(m1).astype(jnp.int32)
        n2 = jnp.sum(m2).astype(jnp.int32)
        n3 = jnp.sum(m3).astype(jnp.int32)
        nt = jnp.maximum(n1 + n2 + n3, 1)                      # guard nt == 0
        counts = jnp.stack([n1, n2, n3, nt])

        # Exactly one drug row assumed (as the reference requires); zero if absent.
        drug_row = d1_eb[eidx[jnp.argmax(m1)]] * (n1 > 0).astype(f32)

        # Gathers at ORIGINAL positions; invalid rows zeroed (no argsort/compaction).
        indi = d2_eb[eidx] * m2[:, None].astype(f32)           # (N, r3)
        adr = d3_eb[eidx] * m3[:, None].astype(f32)            # (N, r3)

        # Rank-based strict-upper-triangle mask (order-exact, no sort).
        rank_i = jnp.cumsum(m2.astype(jnp.int32)) - 1
        rank_a = jnp.cumsum(m3.astype(jnp.int32)) - 1
        tri = (rank_a[None, :] > rank_i[:, None]) & m2[:, None] & m3[None, :]
        adr_pref = tri.astype(f32) @ adr                       # (N, r3)

        pad = ((0, np8 - N), (0, 0))
        drug_sec = jnp.zeros((8, r3), f32).at[0].set(drug_row)  # rows 1..7 dead
        emb = jnp.concatenate(
            [drug_sec, jnp.pad(indi, pad), jnp.pad(adr, pad),
             jnp.pad(adr_pref, pad)], axis=0)                  # (8 + 3*np8, r3)
        emb = jnp.pad(emb, ((0, 0), (0, _LANES - r3)))         # lane-pad to 128
        return counts, emb

    counts, emb = jax.vmap(prep_one)(indices)   # (B, 4) int32, (B, rows, 128)
    return _pallas_bilinear_sim(counts, emb, packed["bcat"], packed["par"], np8)


def _reference(drug, indi, adr, params):
    """Pure-jnp reference of the per-instance math, for verification."""
    emb = jnp.concatenate([drug, indi, adr], axis=0)
    b1 = jnp.sum(drug @ params["b1"] @ indi.T)
    b2 = jnp.sum(drug @ params["b2"] @ adr.T)
    t3 = indi @ params["b3"] @ adr.T
    b3 = jnp.sum(jnp.triu(t3, k=1))
    B = jnp.stack([b1, b2, b3])[None, :]                       # (1, 3)
    B2 = jnp.mean(emb @ params["w_b2"].T + params["bias_b2"], axis=0)
    x = jnp.tanh(B + B2 + params["b_lin"])
    return x @ params["w_sim"].T + params["bias_sim"]


# --------------------------------- main ------------------------------------ #
if __name__ == "__main__":
    r3 = 32        # embedding dim
    K = 3          # B has 3 bilinear entries -> Linear(r3, K=3)
    d1, d2, d3 = 0, 1, 2

    key = jax.random.PRNGKey(0)
    keys = jax.random.split(key, 12)

    params = {
        "b1": jax.random.normal(keys[0], (r3, r3), jnp.float32),
        "b2": jax.random.normal(keys[1], (r3, r3), jnp.float32),
        "b3": jax.random.normal(keys[2], (r3, r3), jnp.float32),
        "w_b2": jax.random.normal(keys[3], (K, r3), jnp.float32) * 0.1,
        "bias_b2": jax.random.normal(keys[4], (K,), jnp.float32) * 0.1,
        "w_sim": jax.random.normal(keys[5], (1, K), jnp.float32) * 0.1,
        "bias_sim": jax.random.normal(keys[6], (1,), jnp.float32) * 0.1,
        "b_lin": jax.random.normal(keys[7], (K,), jnp.float32),
    }
    packed = pack_params(params)

    d1_eb = jax.random.normal(keys[8], (10, r3), jnp.float32)
    d2_eb = jax.random.normal(keys[9], (12, r3), jnp.float32)
    d3_eb = jax.random.normal(keys[10], (14, r3), jnp.float32)

    # (B, N, 2) batch of index lists; each row is [dim_tag, embedding_index].
    # Rows with sum == 0 are filtered (reference semantics); exactly one valid
    # drug (tag d1) row per instance; indi/adr rows deliberately interleaved to
    # exercise the rank-based triu mask; one instance has zero adr rows.
    indices = jnp.array(
        [
            [[0, 3], [1, 2], [2, 1], [1, 5], [2, 4], [0, 0], [1, 7], [2, 7]],
            [[1, 1], [0, 6], [2, 3], [2, 9], [1, 11], [2, 5], [0, 0], [2, 13]],
            [[2, 2], [1, 0], [0, 9], [1, 4], [2, 8], [1, 10], [1, 6], [2, 0]],
            [[0, 1], [1, 3], [0, 0], [1, 9], [0, 0], [0, 0], [0, 0], [0, 0]],
        ],
        dtype=jnp.int32)

    sim = get_bilinear_sim(indices, d1_eb, d2_eb, d3_eb, packed, d1, d2, d3)
    sim = jax.block_until_ready(sim)                            # (B, 1)

    # Verify against the pure-jnp reference (host-side filtering only for the check).
    idx_np = np.asarray(indices)
    refs = []
    for b in range(idx_np.shape[0]):
        row = idx_np[b]
        row = row[row.sum(axis=1) != 0]
        drug = d1_eb[jnp.asarray(row[row[:, 0] == d1, 1])]
        indi = d2_eb[jnp.asarray(row[row[:, 0] == d2, 1])]
        adr = d3_eb[jnp.asarray(row[row[:, 0] == d3, 1])]
        refs.append(np.asarray(_reference(drug, indi, adr, params)))
    ref = np.concatenate(refs, axis=0)                          # (B, 1)

    np.testing.assert_allclose(np.asarray(sim), ref, rtol=5e-4, atol=5e-4)
    print("KERNEL_OK")
</pallas_src>

<mosaic_0001>
module attributes {stable_mosaic.version = 11 : i64} {
  func.func @kernel(%arg0: i32, %arg1: memref<4x4xi32, #tpu.memory_space<smem>>, %arg2: memref<1x32x128xf32, #tpu.memory_space<vmem>>, %arg3: memref<128x512xf32, #tpu.memory_space<vmem>>, %arg4: memref<8x128xf32, #tpu.memory_space<vmem>>, %arg5: memref<1x1x128xf32, #tpu.memory_space<vmem>>) attributes {dimension_semantics = [#tpu.dimension_semantics<parallel>], iteration_bounds = array<i64: 4>, scalar_prefetch = 1 : i64, scratch_operands = 0 : i64, tpu.core_type = #tpu.core_type<tc>, window_params = [{transform_indices = @transform_0, window_bounds = array<i64: 1, 32, 128>}, {pipeline_mode = #tpu.pipeline_mode<synchronous>, transform_indices = @transform_1, window_bounds = array<i64: 128, 512>}, {pipeline_mode = #tpu.pipeline_mode<synchronous>, transform_indices = @transform_2, window_bounds = array<i64: 8, 128>}, {transform_indices = @transform_3, window_bounds = array<i64: 1, 1, 128>}]} {
    %0 = arith.index_cast %arg0 : i32 to index
    %c3 = arith.constant 3 : index
    %1 = memref.load %arg1[%0, %c3] : memref<4x4xi32, #tpu.memory_space<smem>>
    %2 = arith.sitofp %1 : i32 to f32
    %cst = arith.constant 1.000000e+00 : f32
    %3 = arith.divf %cst, %2 : f32
    %c0 = arith.constant 0 : index
    %c0_0 = arith.constant 0 : index
    %c0_1 = arith.constant 0 : index
    %4 = vector.load %arg2[%c0, %c0_0, %c0_1] : memref<1x32x128xf32, #tpu.memory_space<vmem>>, vector<1x32x128xf32>
    %5 = vector.shape_cast %4 : vector<1x32x128xf32> to vector<32x128xf32>
    %c0_2 = arith.constant 0 : index
    %c0_3 = arith.constant 0 : index
    %6 = vector.load %arg3[%c0_2, %c0_3] : memref<128x512xf32, #tpu.memory_space<vmem>>, vector<128x512xf32>
    %cst_4 = arith.constant dense<0.000000e+00> : vector<32x512xf32>
    %7 = tpu.matmul %5, %6, %cst_4 {dimension_numbers = #tpu.dot_dimension_numbers<[1], [0], [0], [1], [0, 0, 1, 1], [], []>} : vector<32x128xf32>, vector<128x512xf32>, vector<32x512xf32> -> vector<32x512xf32>
    %8 = vector.extract_strided_slice %7 {offsets = [0, 0], sizes = [1, 128], strides = [1, 1]} : vector<32x512xf32> to vector<1x128xf32>
    %9 = vector.extract_strided_slice %7 {offsets = [0, 128], sizes = [1, 128], strides = [1, 1]} : vector<32x512xf32> to vector<1x128xf32>
    %10 = vector.extract_strided_slice %7 {offsets = [8, 256], sizes = [8, 128], strides = [1, 1]} : vector<32x512xf32> to vector<8x128xf32>
    %11 = vector.extract_strided_slice %7 {offsets = [0, 384], sizes = [24, 128], strides = [1, 1]} : vector<32x512xf32> to vector<24x128xf32>
    %12 = vector.extract_strided_slice %5 {offsets = [8, 0], sizes = [8, 128], strides = [1, 1]} : vector<32x128xf32> to vector<8x128xf32>
    %13 = vector.extract_strided_slice %5 {offsets = [16, 0], sizes = [8, 128], strides = [1, 1]} : vector<32x128xf32> to vector<8x128xf32>
    %14 = vector.extract_strided_slice %5 {offsets = [24, 0], sizes = [8, 128], strides = [1, 1]} : vector<32x128xf32> to vector<8x128xf32>
    %cst_5 = arith.constant dense<0.000000e+00> : vector<128xf32>
    %15 = vector.multi_reduction <add>, %12, %cst_5 [0] : vector<8x128xf32> to vector<128xf32>
    %16 = vector.shape_cast %15 : vector<128xf32> to vector<1x128xf32>
    %cst_6 = arith.constant dense<0.000000e+00> : vector<128xf32>
    %17 = vector.multi_reduction <add>, %13, %cst_6 [0] : vector<8x128xf32> to vector<128xf32>
    %18 = vector.shape_cast %17 : vector<128xf32> to vector<1x128xf32>
    %19 = arith.mulf %8, %16 : vector<1x128xf32>
    %20 = vector.shape_cast %19 : vector<1x128xf32> to vector<1x1x128xf32>
    %cst_7 = arith.constant dense<0.000000e+00> : vector<1xf32>
    %21 = vector.multi_reduction <add>, %20, %cst_7 [1, 2] : vector<1x1x128xf32> to vector<1xf32>
    %22 = vector.shape_cast %21 : vector<1xf32> to vector<1x1x1xf32>
    %23 = vector.extract %22[0, 0, 0] : f32 from vector<1x1x1xf32>
    %24 = arith.mulf %9, %18 : vector<1x128xf32>
    %25 = vector.shape_cast %24 : vector<1x128xf32> to vector<1x1x128xf32>
    %cst_8 = arith.constant dense<0.000000e+00> : vector<1xf32>
    %26 = vector.multi_reduction <add>, %25, %cst_8 [1, 2] : vector<1x1x128xf32> to vector<1xf32>
    %27 = vector.shape_cast %26 : vector<1xf32> to vector<1x1x1xf32>
    %28 = vector.extract %27[0, 0, 0] : f32 from vector<1x1x1xf32>
    %29 = arith.mulf %10, %14 : vector<8x128xf32>
    %30 = vector.shape_cast %29 : vector<8x128xf32> to vector<1x8x128xf32>
    %cst_9 = arith.constant dense<0.000000e+00> : vector<1xf32>
    %31 = vector.multi_reduction <add>, %30, %cst_9 [1, 2] : vector<1x8x128xf32> to vector<1xf32>
    %32 = vector.shape_cast %31 : vector<1xf32> to vector<1x1x1xf32>
    %33 = vector.extract %32[0, 0, 0] : f32 from vector<1x1x1xf32>
    %cst_10 = arith.constant dense<0.000000e+00> : vector<128xf32>
    %34 = vector.multi_reduction <add>, %11, %cst_10 [0] : vector<24x128xf32> to vector<128xf32>
    %35 = vector.shape_cast %34 : vector<128xf32> to vector<1x128xf32>
    %36 = vector.broadcast %3 : f32 to vector<1x128xf32>
    %37 = arith.mulf %35, %36 : vector<1x128xf32>
    %38 = tpu.iota {dimensions = array<i32: 1>} : vector<1x128xi32>
    %c0_i32 = arith.constant 0 : i32
    %39 = vector.broadcast %c0_i32 : i32 to vector<1x128xi32>
    %40 = arith.cmpi eq, %38, %39 : vector<1x128xi32>
    %c1_i32 = arith.constant 1 : i32
    %41 = vector.broadcast %c1_i32 : i32 to vector<1x128xi32>
    %42 = arith.cmpi eq, %38, %41 : vector<1x128xi32>
    %c2_i32 = arith.constant 2 : i32
    %43 = vector.broadcast %c2_i32 : i32 to vector<1x128xi32>
    %44 = arith.cmpi eq, %38, %43 : vector<1x128xi32>
    %cst_11 = arith.constant 0.000000e+00 : f32
    %45 = vector.broadcast %33 : f32 to vector<1x128xf32>
    %46 = vector.broadcast %cst_11 : f32 to vector<1x128xf32>
    %47 = arith.select %44, %45, %46 : vector<1x128xi1>, vector<1x128xf32>
    %48 = vector.broadcast %28 : f32 to vector<1x128xf32>
    %49 = arith.select %42, %48, %47 : vector<1x128xi1>, vector<1x128xf32>
    %50 = vector.broadcast %23 : f32 to vector<1x128xf32>
    %51 = arith.select %40, %50, %49 : vector<1x128xi1>, vector<1x128xf32>
    %c0_12 = arith.constant 0 : index
    %c0_13 = arith.constant 0 : index
    %52 = vector.load %arg4[%c0_12, %c0_13] : memref<8x128xf32, #tpu.memory_space<vmem>>, vector<8x128xf32>
    %53 = vector.extract_strided_slice %52 {offsets = [0, 0], sizes = [1, 128], strides = [1, 1]} : vector<8x128xf32> to vector<1x128xf32>
    %54 = vector.extract_strided_slice %52 {offsets = [1, 0], sizes = [1, 128], strides = [1, 1]} : vector<8x128xf32> to vector<1x128xf32>
    %55 = vector.extract_strided_slice %52 {offsets = [2, 0], sizes = [1, 128], strides = [1, 1]} : vector<8x128xf32> to vector<1x128xf32>
    %56 = arith.addf %51, %37 : vector<1x128xf32>
    %57 = arith.addf %56, %53 : vector<1x128xf32>
    %58 = math.tanh %57 : vector<1x128xf32>
    %59 = arith.mulf %58, %54 : vector<1x128xf32>
    %60 = arith.addf %59, %55 : vector<1x128xf32>
    %61 = vector.shape_cast %60 : vector<1x128xf32> to vector<1x1x128xf32>
    %cst_14 = arith.constant dense<0.000000e+00> : vector<1xf32>
    %62 = vector.multi_reduction <add>, %61, %cst_14 [1, 2] : vector<1x1x128xf32> to vector<1xf32>
    %63 = vector.shape_cast %62 : vector<1xf32> to vector<1x1x1xf32>
    %64 = vector.extract %63[0, 0, 0] : f32 from vector<1x1x1xf32>
    %65 = vector.broadcast %64 : f32 to vector<1x1x128xf32>
    %c0_15 = arith.constant 0 : index
    %c0_16 = arith.constant 0 : index
    %c0_17 = arith.constant 0 : index
    %66 = vector.load %arg5[%c0_15, %c0_16, %c0_17] : memref<1x1x128xf32, #tpu.memory_space<vmem>>, vector<1x1x128xf32>
    tpu.vector_store %arg5[%c0_15, %c0_16, %c0_17], %65 {strides = array<i32>} : memref<1x1x128xf32, #tpu.memory_space<vmem>>, vector<1x1x128xf32>,
    return
  }
  func.func @transform_0(%arg0: i32, %arg1: memref<4x4xi32, #tpu.memory_space<smem>>) -> (i32, i32, i32) {
    %c0_i32 = arith.constant 0 : i32
    %c0_i32_0 = arith.constant 0 : i32
    %c0_i32_1 = arith.constant 0 : i32
    return %arg0, %c0_i32, %c0_i32_0 : i32, i32, i32
  }
  func.func @transform_1(%arg0: i32, %arg1: memref<4x4xi32, #tpu.memory_space<smem>>) -> (i32, i32) {
    %c0_i32 = arith.constant 0 : i32
    %c0_i32_0 = arith.constant 0 : i32
    %c0_i32_1 = arith.constant 0 : i32
    return %c0_i32, %c0_i32_0 : i32, i32
  }
  func.func @transform_2(%arg0: i32, %arg1: memref<4x4xi32, #tpu.memory_space<smem>>) -> (i32, i32) {
    %c0_i32 = arith.constant 0 : i32
    %c0_i32_0 = arith.constant 0 : i32
    %c0_i32_1 = arith.constant 0 : i32
    return %c0_i32, %c0_i32_0 : i32, i32
  }
  func.func @transform_3(%arg0: i32, %arg1: memref<4x4xi32, #tpu.memory_space<smem>>) -> (i32, i32, i32) {
    %c0_i32 = arith.constant 0 : i32
    %c0_i32_0 = arith.constant 0 : i32
    %c0_i32_1 = arith.constant 0 : i32
    return %arg0, %c0_i32, %c0_i32_0 : i32, i32, i32
  }
}

</mosaic_0001>

<bundles_post_ra>
// kernel: mul.4
= control target key start
LH: loop header
LB: loop body
LE: loop exit
PB: predicated region body
PF: predicated region fallthrough
CT: control target
= control target key end

     0   :  { %s100_s0 = inlined_call_operand.vmem [shape: f32[4,1,32], index: 0, kind: input, shape index: {}]   ;;  %s101_s1 = inlined_call_operand.vmem [shape: f32[4,1,32], index: 1, kind: input, shape index: {}]   ;;  %s102_s2 = inlined_call_operand.vmem [shape: f32[4,1,32], index: 2, kind: output, shape index: {}]  }
   0x1   :  { %v3_v0 = vld [vmem:[%s100_s0] sm:$0x1]  ;;  %v40_v2 = vld [vmem:[%s100_s0 + $0x1] sm:$0x1]  ;;  %v43_v5 = vld [vmem:[%s100_s0 + $0x2] sm:$0x1] }
   0x2   :  { %v4_v1 = vld [vmem:[%s101_s1] sm:$0x1]  ;;  %v41_v4 = vld [vmem:[%s101_s1 + $0x1] sm:$0x1]  ;;  %v44_v6 = vld [vmem:[%s101_s1 + $0x2] sm:$0x1] }
   0x3   :  { %v7_v3 = vmul.f32 %v4_v1, %v3_v0  ;;  %v16_v7 = vmul.f32 %v41_v4, %v40_v2  ;;  %v26_v8 = vmul.f32 %v44_v6, %v43_v5  ;;  %v46_v9 = vld [vmem:[%s100_s0 + $0x3] sm:$0x1] }
   0x4   :  { %v47_v10 = vld [vmem:[%s101_s1 + $0x3] sm:$0x1] }
   0x5   :  { %9 = vst [vmem:[%s102_s2] sm:$0x1] %v7_v3  ;;  %v36_v11 = vmul.f32 %v47_v10, %v46_v9  ;;  %42 = vst [vmem:[%s102_s2 + $0x1] sm:$0x1] %v16_v7 }
   0x6   :  { %45 = vst [vmem:[%s102_s2 + $0x2] sm:$0x1] %v26_v8 }
   0x7   :  { %48 = vst [vmem:[%s102_s2 + $0x3] sm:$0x1] %v36_v11 }

// kernel: get_bilinear_sim.1
= control target key start
LH: loop header
LB: loop body
LE: loop exit
PB: predicated region body
PF: predicated region fallthrough
CT: control target
= control target key end

     0   :  { %s941_s0 = inlined_call_operand.vmem [shape: s32[4,4], index: 0, kind: input, shape index: {}]   ;;  %s942_s1 = inlined_call_operand.vmem [shape: f32[4,32,128], index: 1, kind: input, shape index: {}]   ;;  %s943_s2 = inlined_call_operand.vmem [shape: f32[128,512], index: 2, kind: input, shape index: {}]   ;;  %s944_s3 = inlined_call_operand.vmem [shape: f32[8,128], index: 3, kind: input, shape index: {}]   ;;  %s945_s4 = inlined_call_operand.vmem [shape: f32[4,1,128], index: 4, kind: output, shape index: {}]  }
   0x1   :  { %s9_s17 = sshll.u32 %s941_s0, 4  ;;  %s10_s17 = int_to_ptr.vmem [resolvable:$true] %s9_s17 }
   0x2   :  { %s652_s18 = scalar_lea.vmem %s10_s17, 64  ;;  %p657_p1 = scmp.lt.s32.totalorder %s10_s17, %s10_s17 }
   0x3   :  { %p653_p0 = scmp.ne.s32.totalorder %s10_s17, %s652_s18  ;;  %p658_p2 = scmp.lt.s32.totalorder %s652_s18, %s652_s18 }
   0x5   :  { %p659_p3 = por %p658_p2, %p657_p1 }
   0x7   :  { %p660_p4 = pnand %p659_p3, %p653_p0 }
   0x9   :  { %663 = shalt.err (!%p660_p4)  }
   0xa   :  { %s674_s19 = smov [#allocation3]  }
   0xb   :  { %12 = dma.vmem_to_smem %s10_s17, 64, %s674_s19, [#allocation2] }
   0xc   :  { %668 = dma.done.wait [#allocation2], 64 }
   0xd   :  { %669 = vsyncadd [#allocation2], 4294967232 }
   0xe   :  { %14 = sfence }
   0xf   :  { %s704_s20 = smov 0  }
  0x10 LB: > { %s710_s0 = sadd.s32 4294967295, %s672_s20   ;;  %p557_p5 = scmp.ge.s32.totalorder %s672_s20, 1  ;;  %s672_s20 = sphi %s704_s20, %s20_s20  }
  0x11   : > { %p144_p6 = scmp.lt.s32.totalorder %s672_s20, 5 }
  0x13   : > { %p145_p7 = pnand %p557_p5, %p144_p6 }
  0x14   : > { %v186_v0 = vld [vmem:[%s943_s2 + $0x8] sm:$0xff] (!%p145_p7)  ;;  %v188_v2 = vld [vmem:[%s943_s2 + $0x18] sm:$0xff] (!%p145_p7)  ;;  %s560_s27 = sshll.u32 (!%p145_p7), %s710_s0, 7  ;;  %v185_v5 = vld [vmem:[%s943_s2] sm:$0xff] (!%p145_p7)  ;;  %v675_v7 = vmov (!%p145_p7), 0.0   ;;  %p166_p8 = scmp.lt.s32.totalorder (!%p145_p7), %s710_s0, 3 }
  0x15   : > { %148 = sbr.rel (%p145_p7) target bundleno = 710 (0x2c6), region = 32  ;;  %v190_v1 = vld [vmem:[%s943_s2 + $0x28] sm:$0xff] (!%p145_p7)  ;;  %v192_v4 = vld [vmem:[%s943_s2 + $0x38] sm:$0xff] (!%p145_p7)  ;;  %v189_v6 = vld [vmem:[%s943_s2 + $0x20] sm:$0xff] (!%p145_p7)  ;;  %313 = vmatprep.mubr.f32.mxu0 (!%p145_p7), %v675_v7  ;;  %396 = vmatprep.mubr.f32.mxu1 (!%p145_p7), %v675_v7  ;;  %s175_s8 = sadd.s32 (!%p145_p7), 3, %s560_s27  ;;  %vm430_vm0 = vcmask (!%p145_p7), 1040384  }
  0x16   : > { %v564_v3 = vpack.c.bf16 (!%p145_p7), %v190_v1, %v186_v0  ;;  %v596_v8 = vpack.c.bf16 (!%p145_p7), %v192_v4, %v188_v2  ;;  %v566_v9 = vpack.c.bf16 (!%p145_p7), %v189_v6, %v185_v5  ;;  %v187_v10 = vld [vmem:[%s943_s2 + $0x10] sm:$0xff] (!%p145_p7)  ;;  %v194_v12 = vld [vmem:[%s943_s2 + $0x48] sm:$0xff] (!%p145_p7)  ;;  %v196_v15 = vld [vmem:[%s943_s2 + $0x58] sm:$0xff] (!%p145_p7)  ;;  %s753_s22 = sld [smem:[#allocation3 + %s175_s8]] (!%p145_p7) }
  0x17   : > { %v191_v11 = vld [vmem:[%s943_s2 + $0x30] sm:$0xff] (!%p145_p7)  ;;  %v198_v14 = vld [vmem:[%s943_s2 + $0x68] sm:$0xff] (!%p145_p7)  ;;  %v200_v16 = vld [vmem:[%s943_s2 + $0x78] sm:$0xff] (!%p145_p7) }
  0x18   : > { %565 = vmatprep.subr.bf16.mxu0 (!%p145_p7), %v564_v3  ;;  %v598_v13 = vpack.c.bf16 (!%p145_p7), %v191_v11, %v187_v10  ;;  %597 = vmatprep.subr.bf16.mxu1 (!%p145_p7), %v596_v8  ;;  %v568_v17 = vpack.c.bf16 (!%p145_p7), %v198_v14, %v194_v12  ;;  %v600_v18 = vpack.c.bf16 (!%p145_p7), %v200_v16, %v196_v15  ;;  %v193_v19 = vld [vmem:[%s943_s2 + $0x40] sm:$0xff] (!%p145_p7)  ;;  %v195_v21 = vld [vmem:[%s943_s2 + $0x50] sm:$0xff] (!%p145_p7)  ;;  %v202_v24 = vld [vmem:[%s943_s2 + $0x88] sm:$0xff] (!%p145_p7) }
  0x19   : > { %567 = vmatpush1.bf16.msra.mxu0 (!%p145_p7), %v566_v9  ;;  %v197_v20 = vld [vmem:[%s943_s2 + $0x60] sm:$0xff] (!%p145_p7)  ;;  %v199_v23 = vld [vmem:[%s943_s2 + $0x70] sm:$0xff] (!%p145_p7)  ;;  %v206_v25 = vld [vmem:[%s943_s2 + $0xa8] sm:$0xff] (!%p145_p7) }
  0x1a   : > { %599 = vmatpush1.bf16.msra.mxu1 (!%p145_p7), %v598_v13  ;;  %v570_v22 = vpack.c.bf16 (!%p145_p7), %v197_v20, %v193_v19  ;;  %569 = vmatprep.subr.bf16.mxu0 (!%p145_p7), %v568_v17  ;;  %v602_v26 = vpack.c.bf16 (!%p145_p7), %v199_v23, %v195_v21  ;;  %v572_v27 = vpack.c.bf16 (!%p145_p7), %v206_v25, %v202_v24  ;;  %v204_v28 = vld [vmem:[%s943_s2 + $0x98] sm:$0xff] (!%p145_p7)  ;;  %v201_v30 = vld [vmem:[%s943_s2 + $0x80] sm:$0xff] (!%p145_p7)  ;;  %v203_v33 = vld [vmem:[%s943_s2 + $0x90] sm:$0xff] (!%p145_p7) }
  0x1b   : > { %601 = vmatprep.subr.bf16.mxu1 (!%p145_p7), %v600_v18  ;;  %v208_v29 = vld [vmem:[%s943_s2 + $0xb8] sm:$0xff] (!%p145_p7)  ;;  %v205_v32 = vld [vmem:[%s943_s2 + $0xa0] sm:$0xff] (!%p145_p7)  ;;  %v207_v34 = vld [vmem:[%s943_s2 + $0xb0] sm:$0xff] (!%p145_p7) }
  0x1c   : > { %v604_v31 = vpack.c.bf16 %v208_v29, %v204_v28  ;;  %v574_v35 = vpack.c.bf16 %v205_v32, %v201_v30  ;;  %v210_v36 = vld [vmem:[%s943_s2 + $0xc8] sm:$0xff]  ;;  %v212_v38 = vld [vmem:[%s943_s2 + $0xd8] sm:$0xff]  ;;  %v606_v39 = vpack.c.bf16 %v207_v34, %v203_v33  ;;  %v209_v42 = vld [vmem:[%s943_s2 + $0xc0] sm:$0xff]  ;;  %s177_s9 = scvt.s32.f32 %s753_s22  ;;  %s947_s0 = smov (!%p166_p8, %s710_s0), 3 }
  0x1d   : > { %571 = vmatpush1.bf16.msra.mxu0 %v570_v22  ;;  %v214_v37 = vld [vmem:[%s943_s2 + $0xe8] sm:$0xff]  ;;  %v216_v41 = vld [vmem:[%s943_s2 + $0xf8] sm:$0xff]  ;;  %v213_v43 = vld [vmem:[%s943_s2 + $0xe0] sm:$0xff]  ;;  %s563_s29 = sshll.u32 %s947_s0, 5  ;;  %s173_s15 = scalar_lea.vmem %s945_s4, %s947_s0 }
  0x1e   : > { %603 = vmatpush1.bf16.msra.mxu1 %v602_v26  ;;  %573 = vmatprep.subr.bf16.mxu0 %v572_v27  ;;  %v576_v40 = vpack.c.bf16 %v214_v37, %v210_v36  ;;  %v608_v44 = vpack.c.bf16 %v216_v41, %v212_v38  ;;  %v211_v45 = vld [vmem:[%s943_s2 + $0xd0] sm:$0xff]  ;;  %v218_v47 = vld [vmem:[%s943_s2 + $0x108] sm:$0xff]  ;;  %v220_v49 = vld [vmem:[%s943_s2 + $0x118] sm:$0xff]  ;;  %v178_v51 = vstv %s177_s9  ;;  %v578_v52 = vpack.c.bf16 %v213_v43, %v209_v42  ;;  %s170_s6 = scalar_lea.vmem %s942_s1, %s563_s29 }
  0x1f   : > { %605 = vmatprep.subr.bf16.mxu1 %v604_v31  ;;  %v215_v46 = vld [vmem:[%s943_s2 + $0xf0] sm:$0xff]  ;;  %v222_v48 = vld [vmem:[%s943_s2 + $0x128] sm:$0xff]  ;;  %v224_v50 = vld [vmem:[%s943_s2 + $0x138] sm:$0xff]  ;;  %648 = vrcp.f32 %v178_v51 }
  0x20   : > { %v610_v53 = vpack.c.bf16 %v215_v46, %v211_v45  ;;  %v580_v54 = vpack.c.bf16 %v222_v48, %v218_v47  ;;  %v217_v55 = vld [vmem:[%s943_s2 + $0x100] sm:$0xff]  ;;  %v219_v57 = vld [vmem:[%s943_s2 + $0x110] sm:$0xff]  ;;  %v612_v58 = vpack.c.bf16 %v224_v50, %v220_v49  ;;  %v226_v60 = vld [vmem:[%s943_s2 + $0x148] sm:$0xff] }
  0x21   : > { %575 = vmatpush1.bf16.msra.mxu0 %v574_v35  ;;  %v221_v56 = vld [vmem:[%s943_s2 + $0x120] sm:$0xff]  ;;  %v223_v59 = vld [vmem:[%s943_s2 + $0x130] sm:$0xff]  ;;  %v230_v61 = vld [vmem:[%s943_s2 + $0x168] sm:$0xff] }
  0x22   : > { %607 = vmatpush1.bf16.msra.mxu1 %v606_v39  ;;  %577 = vmatprep.subr.bf16.mxu0 %v576_v40  ;;  %v228_v62 = vld [vmem:[%s943_s2 + $0x158] sm:$0xff]  ;;  %v582_v0 = vpack.c.bf16 %v221_v56, %v217_v55  ;;  %v614_v1 = vpack.c.bf16 %v223_v59, %v219_v57  ;;  %v584_v2 = vpack.c.bf16 %v230_v61, %v226_v60  ;;  %v225_v3 = vld [vmem:[%s943_s2 + $0x140] sm:$0xff]  ;;  %v227_v5 = vld [vmem:[%s943_s2 + $0x150] sm:$0xff] }
  0x23   : > { %609 = vmatprep.subr.bf16.mxu1 %v608_v44  ;;  %v232_v63 = vld [vmem:[%s943_s2 + $0x178] sm:$0xff]  ;;  %v229_v4 = vld [vmem:[%s943_s2 + $0x160] sm:$0xff]  ;;  %v231_v8 = vld [vmem:[%s943_s2 + $0x170] sm:$0xff] }
  0x24   : > { %v616_v6 = vpack.c.bf16 %v232_v63, %v228_v62  ;;  %v234_v9 = vld [vmem:[%s943_s2 + $0x188] sm:$0xff]  ;;  %v236_v11 = vld [vmem:[%s943_s2 + $0x198] sm:$0xff]  ;;  %v586_v13 = vpack.c.bf16 %v229_v4, %v225_v3  ;;  %v618_v14 = vpack.c.bf16 %v231_v8, %v227_v5  ;;  %v233_v16 = vld [vmem:[%s943_s2 + $0x180] sm:$0xff] }
  0x25   : > { %579 = vmatpush1.bf16.msra.mxu0 %v578_v52  ;;  %v238_v10 = vld [vmem:[%s943_s2 + $0x1a8] sm:$0xff]  ;;  %v240_v12 = vld [vmem:[%s943_s2 + $0x1b8] sm:$0xff]  ;;  %v237_v17 = vld [vmem:[%s943_s2 + $0x1a0] sm:$0xff] }
  0x26   : > { %611 = vmatpush1.bf16.msra.mxu1 %v610_v53  ;;  %581 = vmatprep.subr.bf16.mxu0 %v580_v54  ;;  %v588_v15 = vpack.c.bf16 %v238_v10, %v234_v9  ;;  %v235_v18 = vld [vmem:[%s943_s2 + $0x190] sm:$0xff]  ;;  %v620_v20 = vpack.c.bf16 %v240_v12, %v236_v11  ;;  %v242_v22 = vld [vmem:[%s943_s2 + $0x1c8] sm:$0xff]  ;;  %v244_v24 = vld [vmem:[%s943_s2 + $0x1d8] sm:$0xff]  ;;  %v590_v26 = vpack.c.bf16 %v237_v17, %v233_v16 }
  0x27   : > { %613 = vmatprep.subr.bf16.mxu1 %v612_v58  ;;  %v239_v21 = vld [vmem:[%s943_s2 + $0x1b0] sm:$0xff]  ;;  %v246_v23 = vld [vmem:[%s943_s2 + $0x1e8] sm:$0xff]  ;;  %v248_v25 = vld [vmem:[%s943_s2 + $0x1f8] sm:$0xff] }
  0x28   : > { %v622_v27 = vpack.c.bf16 %v239_v21, %v235_v18  ;;  %v592_v28 = vpack.c.bf16 %v246_v23, %v242_v22  ;;  %v241_v29 = vld [vmem:[%s943_s2 + $0x1c0] sm:$0xff]  ;;  %v624_v31 = vpack.c.bf16 %v248_v25, %v244_v24  ;;  %v243_v32 = vld [vmem:[%s943_s2 + $0x1d0] sm:$0xff]  ;;  %v182_v37 = vld [vmem:[%s170_s6 + $0x8] sm:$0xff] }
  0x29   : > { %583 = vmatpush1.bf16.msra.mxu0 %v582_v0  ;;  %v649_v19 = vpop.eup %648  ;;  %v245_v30 = vld [vmem:[%s943_s2 + $0x1e0] sm:$0xff]  ;;  %v247_v33 = vld [vmem:[%s943_s2 + $0x1f0] sm:$0xff]  ;;  %v184_v39 = vld [vmem:[%s170_s6 + $0x18] sm:$0xff]  ;;  %v417_v40 = vrot.slane %v182_v37, 4 }
  0x2a   : > { %615 = vmatpush1.bf16.msra.mxu1 %v614_v1  ;;  %585 = vmatprep.subr.bf16.mxu0 %v584_v2  ;;  %628 = vpush %v649_v19  ;;  %v594_v34 = vpack.c.bf16 %v245_v30, %v241_v29  ;;  %v626_v35 = vpack.c.bf16 %v247_v33, %v243_v32  ;;  %v181_v36 = vld [vmem:[%s170_s6] sm:$0xff]  ;;  %v183_v38 = vld [vmem:[%s170_s6 + $0x10] sm:$0xff] }
  0x2b   : > { %617 = vmatprep.subr.bf16.mxu1 %v616_v6  ;;  %v423_v41 = vrot.slane %v183_v38, 4  ;;  %v418_v42 = vadd.f32 %v417_v40, %v182_v37 }
  0x2d   : > { %587 = vmatpush1.bf16.msra.mxu0 %v586_v13  ;;  %v424_v43 = vadd.f32 %v423_v41, %v183_v38  ;;  %v419_v44 = vrot.slane %v418_v42, 2 }
  0x2e   : > { %619 = vmatpush1.bf16.msra.mxu1 %v618_v14  ;;  %589 = vmatprep.subr.bf16.mxu0 %v588_v15 }
  0x2f   : > { %621 = vmatprep.subr.bf16.mxu1 %v620_v20  ;;  %v425_v45 = vrot.slane %v424_v43, 2  ;;  %v420_v46 = vadd.f32 %v419_v44, %v418_v42 }
  0x31   : > { %591 = vmatpush1.bf16.msra.mxu0 %v590_v26  ;;  %v426_v47 = vadd.f32 %v425_v45, %v424_v43  ;;  %v421_v48 = vrot.slane %v420_v46, 1 }
  0x32   : > { %623 = vmatpush1.bf16.msra.mxu1 %v622_v27  ;;  %593 = vmatprep.subr.bf16.mxu0 %v592_v28 }
  0x33   : > { %625 = vmatprep.subr.bf16.mxu1 %v624_v31  ;;  %v427_v49 = vrot.slane %v426_v47, 1  ;;  %v422_v50 = vadd.f32 %v421_v48, %v420_v46  ;;  %v483_v48 = vld [vmem:[%s944_s3] sm:$0xff] }
  0x35   : > { %595 = vmatpush1.bf16.msra.mxu0 %v594_v34  ;;  %v428_v51 = vadd.f32 %v427_v49, %v426_v47 }
  0x36   : > { %627 = vmatpush1.bf16.msra.mxu1 %v626_v35 }
  0x38   : > { %314 = vmatmul.mubr.f32.vlgmr.msra.gmra.mrb[0].mxu0 %v181_v36 }
  0x39   : > { %397 = vmatmul.mubr.f32.vlgmr.msra.gmra.mrb[0].mxu1 %v181_v36  ;;  %319 = vmatprep.mubr.f32.mxu0 %v675_v7  ;;  %v472_v36 = vlaneseq }
  0x3a   : > { %401 = vmatprep.mubr.f32.mxu1 %v675_v7 }
  0x3c   : > { %320 = vmatmul.mubr.f32.gmra.mrb[2].mxu0 %v182_v37 }
  0x3d   : > { %402 = vmatmul.mubr.f32.gmra.mrb[2].mxu1 %v182_v37  ;;  %323 = vmatprep.mubr.f32.mxu0 %v675_v7 }
  0x3e   : > { %407 = vmatprep.mubr.f32.mxu1 %v675_v7 }
  0x40   : > { %324 = vmatmul.mubr.f32.gmra.mrb[4].mxu0 %v183_v38 }
  0x41   : > { %408 = vmatmul.mubr.f32.gmra.mrb[4].mxu1 %v183_v38  ;;  %327 = vmatprep.mubr.f32.mxu0 %v675_v7  ;;  %v473_v38 = vand.u32 127, %v472_v36 }
  0x42   : > { %412 = vmatprep.mubr.f32.mxu1 %v675_v7 }
  0x43   : > { %vm476_vm1 = vcmp.eq.s32.totalorder %v473_v38, 2  ;;  %vm475_vm2 = vcmp.eq.s32.totalorder %v473_v38, 1  ;;  %vm474_vm3 = vcmp.eq.s32.totalorder %v473_v38, 0 }
  0x44   : > { %328 = vmatmul.mubr.f32.gmra.mrb[6].mxu0 %v184_v39 }
  0x45   : > { %413 = vmatmul.mubr.f32.gmra.mrb[6].mxu1 %v184_v39 }
  0x5b   : > { %s629_s7 = spop %628 }
  0x5c   : > { %v470_v40 = vstv %s629_s7 }
 0x10b   : > { %v315_v52 = vpop.f32.mrb[0].mxu0 }
 0x10c   : > { %v429_v53 = vmul.f32 %v422_v50, %v315_v52  ;;  %v398_v54 = vpop.f32.mrb[0].mxu1  ;;  %v317_v7 = vpop.f32.mrb[1].mxu0  ;;  %v491_v52 = vrot.slane %v483_v48, 2 }
 0x10d   : > { %v399_v55 = vpop.f32.mrb[1].mxu1  ;;  %v441_v56 = vmul.f32 %v428_v51, %v317_v7  ;;  %v488_v51 = vrot.slane %v483_v48, 1 }
 0x10e   : > { %v431_v57 = vsel %vm430_vm0, %v429_v53, 0.0 }
 0x10f   : > { %432 = vadd.xlane.f32.xlu0 %v431_v57  ;;  %v321_v58 = vpop.f32.mrb[2].mxu0  ;;  %v442_v0 = vsel %vm430_vm0, %v441_v56, 0.0 }
 0x110   : > { %v403_v59 = vpop.f32.mrb[2].mxu1  ;;  %v322_v60 = vpop.f32.mrb[3].mxu0 }
 0x111   : > { %v405_v61 = vpop.f32.mrb[3].mxu1  ;;  %v452_v62 = vmul.f32 %v403_v59, %v184_v39 }
 0x112   : > { %v462_v63 = vadd.f32 %v405_v61, %v399_v55 }
 0x113   : > { %453 = vadd.xlane.f32.xlu1 %v452_v62  ;;  %443 = vadd.xlane.f32.xlu0 %v442_v0  ;;  %v325_v1 = vpop.f32.mrb[4].mxu0 }
 0x114   : > { %v409_v2 = vpop.f32.mrb[4].mxu1  ;;  %v326_v3 = vpop.f32.mrb[5].mxu0 }
 0x115   : > { %v410_v4 = vpop.f32.mrb[5].mxu1 }
 0x116   : > { %v463_v5 = vadd.f32 %v462_v63, %v410_v4 }
 0x117   : > { %v329_v6 = vpop.f32.mrb[6].mxu0 }
 0x118   : > { %v414_v8 = vpop.f32.mrb[6].mxu1  ;;  %v330_v9 = vpop.f32.mrb[7].mxu0  ;;  %v464_v32 = vrot.slane %v463_v5, 4 }
 0x119   : > { %v415_v10 = vpop.f32.mrb[7].mxu1 }
 0x11a   : > { %v465_v33 = vadd.f32 %v464_v32, %v463_v5 }
 0x11c   : > { %v466_v34 = vrot.slane %v465_v33, 2 }
 0x11e   : > { %v467_v35 = vadd.f32 %v466_v34, %v465_v33 }
 0x120   : > { %v468_v37 = vrot.slane %v467_v35, 1 }
 0x122   : > { %v469_v39 = vadd.f32 %v468_v37, %v467_v35 }
 0x124   : > { %v471_v44 = vmul.f32 %v470_v40, %v469_v39 }
 0x19c   : > { %v433_v11 = vpop.xlane.xlu0 %432 }
 0x19d   : > { %v434_v12 = vrot.slane %v433_v11, 4 }
 0x19f   : > { %v435_v13 = vadd.f32 %v434_v12, %v433_v11 }
 0x1a0   : > { %v454_v14 = vpop.xlane.xlu1 %453  ;;  %v444_v15 = vpop.xlane.xlu0 %443 }
 0x1a1   : > { %v436_v16 = vrot.slane %v435_v13, 2  ;;  %v455_v17 = vrot.slane %v454_v14, 4  ;;  %v445_v18 = vrot.slane %v444_v15, 4 }
 0x1a3   : > { %v456_v19 = vadd.f32 %v455_v17, %v454_v14  ;;  %v446_v20 = vadd.f32 %v445_v18, %v444_v15  ;;  %v437_v21 = vadd.f32 %v436_v16, %v435_v13 }
 0x1a5   : > { %v457_v22 = vrot.slane %v456_v19, 2  ;;  %v447_v23 = vrot.slane %v446_v20, 2  ;;  %v438_v24 = vrot.slane %v437_v21, 1 }
 0x1a7   : > { %v448_v25 = vadd.f32 %v447_v23, %v446_v20  ;;  %v439_v26 = vadd.f32 %v438_v24, %v437_v21  ;;  %v458_v27 = vadd.f32 %v457_v22, %v456_v19 }
 0x1a9   : > { %630 = vpush %v439_v26  ;;  %v449_v28 = vrot.slane %v448_v25, 1  ;;  %v459_v29 = vrot.slane %v458_v27, 1 }
 0x1ab   : > { %v450_v30 = vadd.f32 %v449_v28, %v448_v25  ;;  %v460_v31 = vadd.f32 %v459_v29, %v458_v27 }
 0x1ad   : > { %632 = vpush %v450_v30 }
 0x1ae   : > { %634 = vpush %v460_v31 }
 0x1da   : > { %s631_s8 = spop %630 }
 0x1db   : > { %v481_v45 = vstv %s631_s8 }
 0x1de   : > { %s633_s9 = spop %632 }
 0x1df   : > { %v479_v41 = vstv %s633_s9  ;;  %s635_s10 = spop %634 }
 0x1e0   : > { %v477_v42 = vstv %s635_s10 }
 0x1e1   : > { %v478_v43 = vsel %vm476_vm1, %v477_v42, 0.0 }
 0x1e2   : > { %v480_v46 = vsel %vm475_vm2, %v479_v41, %v478_v43 }
 0x1e3   : > { %v482_v47 = vsel %vm474_vm3, %v481_v45, %v480_v46 }
 0x1e4   : > { %v484_v49 = vadd.f32 %v482_v47, %v471_v44 }
 0x1e6   : > { %v485_v50 = vadd.f32 %v484_v49, %v483_v48 }
 0x1e8   : > { %650 = vtanh.f32 %v485_v50 }
 0x1f2   : > { %v651_v53 = vpop.eup %650 }
 0x1f3   : > { %v490_v54 = vmul.f32 %v651_v53, %v488_v51 }
 0x1f5   : > { %v493_v7 = vadd.f32 %v491_v52, %v490_v54 }
 0x1f7   : > { %v494_v55 = vsel %vm430_vm0, %v493_v7, 0.0 }
 0x1f8   : > { %495 = vadd.xlane.f32.xlu1 %v494_v55 }
 0x285   : > { %v496_v56 = vpop.xlane.xlu1 %495 }
 0x286   : > { %v497_v57 = vrot.slane %v496_v56, 4 }
 0x288   : > { %v498_v58 = vadd.f32 %v497_v57, %v496_v56 }
 0x28a   : > { %v499_v59 = vrot.slane %v498_v58, 2 }
 0x28c   : > { %v500_v60 = vadd.f32 %v499_v59, %v498_v58 }
 0x28e   : > { %v501_v61 = vrot.slane %v500_v60, 1 }
 0x290   : > { %v502_v62 = vadd.f32 %v501_v61, %v500_v60 }
 0x292   : > { %636 = vpush %v502_v62 }
 0x2c3   : > { %s637_s16 = spop %636 }
 0x2c4   : > { %v504_v63 = vstv %s637_s16 }
 0x2c5   : > { %505 = vst [vmem:[%s173_s15] sm:$0x1] %v504_v63 }
 0x2c6 PF: > { %s20_s20 = sadd.s32 1, %s672_s20  }
 0x2c7   : > { %p17_p9 = scmp.ge.s32.totalorder %s20_s20, 6  }
 0x2c9   :  { %19 = sbr.rel (!%p17_p9) target bundleno = 16 (0x10), region = 62 }

</bundles_post_ra>
